<compile_context>
chip_gen: v7x
topology: tpu7x:2x2x1
jax: 0.10.0
libtpu: 0.0.40
codegen_flags: <defaults>
</compile_context>

<pallas_src>
import functools

import jax
import jax.numpy as jnp
import numpy as np
from jax.experimental import pallas as pl
from jax.experimental.pallas import tpu as pltpu

DIM = 16
NEURONS = 32
LAYERS = 3                            # kernel specialized for layers == 3
OUTPUT_SIZE = DIM * (DIM - 1) // 2    # 120 strict-upper-triangle entries
SQ = DIM * DIM                        # 256 (lane-dense output width)


def _softplus(v):
    # matches F.softplus(x, beta=1, threshold=20); exp/log1p use the EUP slot.
    e = jnp.exp(jnp.minimum(v, 20.0))
    return jnp.where(v > 20.0, v, jnp.log1p(e))


def tensornet_kernel(x_ref, w_in_ref, b_in_ref, w_h_ref, b_h_ref,
                     w_out_ref, b_out_ref, out_ref):
    """One batch tile: 3 matmuls + softplus chain; output already antisymmetrized."""
    x = x_ref[...]
    # inputDense + softplus
    h = _softplus(jnp.dot(x, w_in_ref[...], preferred_element_type=jnp.float32)
                  + b_in_ref[...])
    # hidden[0] (Linear) + softplus
    h = _softplus(jnp.dot(h, w_h_ref[...], preferred_element_type=jnp.float32)
                  + b_h_ref[...])
    # hidden[1] (Dropout p=0.5, eval-mode identity) + softplus
    # TODO(synk): training-mode dropout would need pltpu.prng_seed/prng_random_bits.
    h = _softplus(h)
    # outputDense with scatter/transpose/subtract pre-folded into the weights:
    # emits the flattened (DIM*DIM) antisymmetric matrix directly.
    out_ref[...] = (jnp.dot(h, w_out_ref[...], preferred_element_type=jnp.float32)
                    + b_out_ref[...]).astype(out_ref.dtype)


def _round_up(n, m):
    return (n + m - 1) // m * m


def _antisym_matrix():
    """A (OUTPUT_SIZE, DIM*DIM): data @ A == flatten(z - z^T) for upper-tri scatter z."""
    tri_i, tri_j = np.triu_indices(DIM, k=1)          # row-major, matches torch
    A = np.zeros((OUTPUT_SIZE, SQ), dtype=np.float32)
    k = np.arange(OUTPUT_SIZE)
    A[k, tri_i * DIM + tri_j] = 1.0
    A[k, tri_j * DIM + tri_i] = -1.0
    return jnp.asarray(A)


def fold_output_params(w_out, b_out):
    """Fold the antisymmetrization into the last Linear layer (done once, offline)."""
    A = _antisym_matrix()                              # (120, 256)
    return w_out @ A, b_out @ A                        # (NEURONS, 256), (1, 256)


def _choose_tile(B, block_b):
    """Sublane-aligned batch tile, capped so the grid has >=2 steps when B allows.

    The >=2-step cap lets dimension_semantics=("parallel",) shard the batch axis
    across both TensorCores on v7x; for B >= 1024 the tile stays >= 512 rows so
    single-TC chips (v5e/v6e) remain near the HBM roofline.
    """
    tb = min(block_b, _round_up(B, 8))
    if B >= 16:
        tb = min(tb, _round_up(-(-B // 2), 8))
    return max(tb, 8)


@functools.partial(jax.jit, static_argnames=("block_b", "out_dtype"))
def tensornet_forward(x, kernel_params, *, block_b=1024, out_dtype=jnp.float32):
    """x: (B, DIM) f32 -> (B, DIM, DIM) antisymmetric (out_dtype)."""
    w_in, b_in, w_h, b_h, w_out_eff, b_out_eff = kernel_params
    B = x.shape[0]
    tb = _choose_tile(B, block_b)
    grid = (pl.cdiv(B, tb),)                           # ragged last block handled by Pallas

    def pinned(shape):
        # weights/biases: constant block index -> fetched once, VMEM-resident.
        return pl.BlockSpec(shape, lambda i: (0, 0))

    flat = pl.pallas_call(
        tensornet_kernel,
        out_shape=jax.ShapeDtypeStruct((B, SQ), out_dtype),   # exact B: no pad, no slice copy
        grid=grid,
        in_specs=[
            pl.BlockSpec((tb, DIM), lambda i: (i, 0)),  # x streams per batch tile
            pinned((DIM, NEURONS)), pinned((1, NEURONS)),
            pinned((NEURONS, NEURONS)), pinned((1, NEURONS)),
            pinned((NEURONS, SQ)), pinned((1, SQ)),
        ],
        out_specs=pl.BlockSpec((tb, SQ), lambda i: (i, 0)),   # lane-dense 256-wide slab
        compiler_params=pltpu.CompilerParams(
            dimension_semantics=("parallel",)),         # 2 TCs on v7x; harmless elsewhere
    )(x, w_in, b_in, w_h, b_h, w_out_eff, b_out_eff)

    return flat.reshape(B, DIM, DIM)                    # contiguous reshape: free


def init_params(key):
    """Deterministic init. Weights stored as (in, out); biases as (1, out)."""
    k = jax.random.split(key, 6)

    def lin(kw, kb, fan_in, fan_out):
        bound = 1.0 / np.sqrt(fan_in)
        w = jax.random.uniform(kw, (fan_in, fan_out), jnp.float32, -bound, bound)
        b = jax.random.uniform(kb, (1, fan_out), jnp.float32, -bound, bound)
        return w, b

    w_in, b_in = lin(k[0], k[1], DIM, NEURONS)             # inputDense
    w_h, b_h = lin(k[2], k[3], NEURONS, NEURONS)           # hidden[0] Linear
    w_out, b_out = lin(k[4], k[5], NEURONS, OUTPUT_SIZE)   # outputDense
    return (w_in, b_in, w_h, b_h, w_out, b_out)


def _reference(x, params):
    """Pure-JAX reference of the original module forward (scatter + z - z^T)."""
    w_in, b_in, w_h, b_h, w_out, b_out = params
    h = _softplus(x @ w_in + b_in)
    h = _softplus(h @ w_h + b_h)
    h = _softplus(h)                                    # dropout (identity) + softplus
    data = h @ w_out + b_out
    tri_i, tri_j = jnp.triu_indices(DIM, k=1)
    z = jnp.zeros((x.shape[0], DIM, DIM), dtype=data.dtype).at[:, tri_i, tri_j].set(data)
    return z - jnp.transpose(z, (0, 2, 1))


if __name__ == "__main__":
    key = jax.random.PRNGKey(0)
    kx, kx2, kp = jax.random.split(key, 3)

    params = init_params(kp)
    w_in, b_in, w_h, b_h, w_out, b_out = params
    w_out_eff, b_out_eff = fold_output_params(w_out, b_out)
    kernel_params = (w_in, b_in, w_h, b_h, w_out_eff, b_out_eff)

    # Small deterministic check: batch of 64 rows of dim-16 input (tile=32, 2 grid steps).
    BATCH = 64
    x = jax.random.normal(kx, (BATCH, DIM), dtype=jnp.float32)
    out = jax.block_until_ready(tensornet_forward(x, kernel_params))
    ref = jax.block_until_ready(_reference(x, params))
    assert out.shape == (BATCH, DIM, DIM)
    assert np.allclose(np.asarray(out), np.asarray(ref), atol=1e-5, rtol=1e-5)
    # antisymmetry sanity check (z - z^T, zero diagonal)
    assert np.allclose(np.asarray(out), -np.asarray(out).transpose(0, 2, 1), atol=1e-6)

    # Second check: batch not a multiple of the tile -> exercises the ragged last
    # block (no padding, no post-kernel slice copy).
    BATCH2 = 52
    x2 = jax.random.normal(kx2, (BATCH2, DIM), dtype=jnp.float32)
    out2 = jax.block_until_ready(tensornet_forward(x2, kernel_params))
    ref2 = jax.block_until_ready(_reference(x2, params))
    assert out2.shape == (BATCH2, DIM, DIM)
    assert np.allclose(np.asarray(out2), np.asarray(ref2), atol=1e-5, rtol=1e-5)

    print("KERNEL_OK")
</pallas_src>

<mosaic_0001>
module attributes {stable_mosaic.version = 11 : i64} {
  func.func @tensornet_kernel(%arg0: i32, %arg1: memref<32x16xf32, #tpu.memory_space<vmem>>, %arg2: memref<16x32xf32, #tpu.memory_space<vmem>>, %arg3: memref<1x32xf32, #tpu.memory_space<vmem>>, %arg4: memref<32x32xf32, #tpu.memory_space<vmem>>, %arg5: memref<1x32xf32, #tpu.memory_space<vmem>>, %arg6: memref<32x256xf32, #tpu.memory_space<vmem>>, %arg7: memref<1x256xf32, #tpu.memory_space<vmem>>, %arg8: memref<32x256xf32, #tpu.memory_space<vmem>>) attributes {dimension_semantics = [#tpu.dimension_semantics<parallel>], iteration_bounds = array<i64: 2>, scalar_prefetch = 0 : i64, scratch_operands = 0 : i64, tpu.core_type = #tpu.core_type<tc>, window_params = [{transform_indices = @transform_0, window_bounds = array<i64: 32, 16>}, {pipeline_mode = #tpu.pipeline_mode<synchronous>, transform_indices = @transform_1, window_bounds = array<i64: 16, 32>}, {pipeline_mode = #tpu.pipeline_mode<synchronous>, transform_indices = @transform_2, window_bounds = array<i64: 1, 32>}, {pipeline_mode = #tpu.pipeline_mode<synchronous>, transform_indices = @transform_3, window_bounds = array<i64: 32, 32>}, {pipeline_mode = #tpu.pipeline_mode<synchronous>, transform_indices = @transform_4, window_bounds = array<i64: 1, 32>}, {pipeline_mode = #tpu.pipeline_mode<synchronous>, transform_indices = @transform_5, window_bounds = array<i64: 32, 256>}, {pipeline_mode = #tpu.pipeline_mode<synchronous>, transform_indices = @transform_6, window_bounds = array<i64: 1, 256>}, {transform_indices = @transform_7, window_bounds = array<i64: 32, 256>}]} {
    %c0 = arith.constant 0 : index
    %c0_0 = arith.constant 0 : index
    %0 = vector.load %arg1[%c0, %c0_0] : memref<32x16xf32, #tpu.memory_space<vmem>>, vector<32x16xf32>
    %c0_1 = arith.constant 0 : index
    %c0_2 = arith.constant 0 : index
    %1 = vector.load %arg2[%c0_1, %c0_2] : memref<16x32xf32, #tpu.memory_space<vmem>>, vector<16x32xf32>
    %cst = arith.constant dense<0.000000e+00> : vector<32x32xf32>
    %2 = tpu.matmul %0, %1, %cst {dimension_numbers = #tpu.dot_dimension_numbers<[1], [0], [0], [1], [0, 0, 1, 1], [], []>} : vector<32x16xf32>, vector<16x32xf32>, vector<32x32xf32> -> vector<32x32xf32>
    %c0_3 = arith.constant 0 : index
    %c0_4 = arith.constant 0 : index
    %3 = vector.load %arg3[%c0_3, %c0_4] : memref<1x32xf32, #tpu.memory_space<vmem>>, vector<1x32xf32>
    %4 = vector.broadcast %3 : vector<1x32xf32> to vector<32x32xf32>
    %5 = arith.addf %2, %4 : vector<32x32xf32>
    %cst_5 = arith.constant 2.000000e+01 : f32
    %6 = vector.broadcast %cst_5 : f32 to vector<32x32xf32>
    %7 = arith.minimumf %5, %6 : vector<32x32xf32>
    %8 = math.exp %7 : vector<32x32xf32>
    %cst_6 = arith.constant 2.000000e+01 : f32
    %9 = vector.broadcast %cst_6 : f32 to vector<32x32xf32>
    %10 = arith.cmpf ogt, %5, %9 : vector<32x32xf32>
    %11 = math.log1p %8 : vector<32x32xf32>
    %12 = arith.select %10, %5, %11 : vector<32x32xi1>, vector<32x32xf32>
    %c0_7 = arith.constant 0 : index
    %c0_8 = arith.constant 0 : index
    %13 = vector.load %arg4[%c0_7, %c0_8] : memref<32x32xf32, #tpu.memory_space<vmem>>, vector<32x32xf32>
    %cst_9 = arith.constant dense<0.000000e+00> : vector<32x32xf32>
    %14 = tpu.matmul %12, %13, %cst_9 {dimension_numbers = #tpu.dot_dimension_numbers<[1], [0], [0], [1], [0, 0, 1, 1], [], []>} : vector<32x32xf32>, vector<32x32xf32>, vector<32x32xf32> -> vector<32x32xf32>
    %c0_10 = arith.constant 0 : index
    %c0_11 = arith.constant 0 : index
    %15 = vector.load %arg5[%c0_10, %c0_11] : memref<1x32xf32, #tpu.memory_space<vmem>>, vector<1x32xf32>
    %16 = vector.broadcast %15 : vector<1x32xf32> to vector<32x32xf32>
    %17 = arith.addf %14, %16 : vector<32x32xf32>
    %cst_12 = arith.constant 2.000000e+01 : f32
    %18 = vector.broadcast %cst_12 : f32 to vector<32x32xf32>
    %19 = arith.minimumf %17, %18 : vector<32x32xf32>
    %20 = math.exp %19 : vector<32x32xf32>
    %cst_13 = arith.constant 2.000000e+01 : f32
    %21 = vector.broadcast %cst_13 : f32 to vector<32x32xf32>
    %22 = arith.cmpf ogt, %17, %21 : vector<32x32xf32>
    %23 = math.log1p %20 : vector<32x32xf32>
    %24 = arith.select %22, %17, %23 : vector<32x32xi1>, vector<32x32xf32>
    %cst_14 = arith.constant 2.000000e+01 : f32
    %25 = vector.broadcast %cst_14 : f32 to vector<32x32xf32>
    %26 = arith.minimumf %24, %25 : vector<32x32xf32>
    %27 = math.exp %26 : vector<32x32xf32>
    %cst_15 = arith.constant 2.000000e+01 : f32
    %28 = vector.broadcast %cst_15 : f32 to vector<32x32xf32>
    %29 = arith.cmpf ogt, %24, %28 : vector<32x32xf32>
    %30 = math.log1p %27 : vector<32x32xf32>
    %31 = arith.select %29, %24, %30 : vector<32x32xi1>, vector<32x32xf32>
    %c0_16 = arith.constant 0 : index
    %c0_17 = arith.constant 0 : index
    %32 = vector.load %arg6[%c0_16, %c0_17] : memref<32x256xf32, #tpu.memory_space<vmem>>, vector<32x256xf32>
    %cst_18 = arith.constant dense<0.000000e+00> : vector<32x256xf32>
    %33 = tpu.matmul %31, %32, %cst_18 {dimension_numbers = #tpu.dot_dimension_numbers<[1], [0], [0], [1], [0, 0, 1, 1], [], []>} : vector<32x32xf32>, vector<32x256xf32>, vector<32x256xf32> -> vector<32x256xf32>
    %c0_19 = arith.constant 0 : index
    %c0_20 = arith.constant 0 : index
    %34 = vector.load %arg7[%c0_19, %c0_20] : memref<1x256xf32, #tpu.memory_space<vmem>>, vector<1x256xf32>
    %35 = vector.broadcast %34 : vector<1x256xf32> to vector<32x256xf32>
    %36 = arith.addf %33, %35 : vector<32x256xf32>
    %c0_21 = arith.constant 0 : index
    %c0_22 = arith.constant 0 : index
    %37 = vector.load %arg8[%c0_21, %c0_22] : memref<32x256xf32, #tpu.memory_space<vmem>>, vector<32x256xf32>
    tpu.vector_store %arg8[%c0_21, %c0_22], %36 {strides = array<i32>} : memref<32x256xf32, #tpu.memory_space<vmem>>, vector<32x256xf32>,
    return
  }
  func.func @transform_0(%arg0: i32) -> (i32, i32) {
    %c0_i32 = arith.constant 0 : i32
    %c0_i32_0 = arith.constant 0 : i32
    return %arg0, %c0_i32 : i32, i32
  }
  func.func @transform_1(%arg0: i32) -> (i32, i32) {
    %c0_i32 = arith.constant 0 : i32
    %c0_i32_0 = arith.constant 0 : i32
    %c0_i32_1 = arith.constant 0 : i32
    return %c0_i32, %c0_i32_0 : i32, i32
  }
  func.func @transform_2(%arg0: i32) -> (i32, i32) {
    %c0_i32 = arith.constant 0 : i32
    %c0_i32_0 = arith.constant 0 : i32
    %c0_i32_1 = arith.constant 0 : i32
    return %c0_i32, %c0_i32_0 : i32, i32
  }
  func.func @transform_3(%arg0: i32) -> (i32, i32) {
    %c0_i32 = arith.constant 0 : i32
    %c0_i32_0 = arith.constant 0 : i32
    %c0_i32_1 = arith.constant 0 : i32
    return %c0_i32, %c0_i32_0 : i32, i32
  }
  func.func @transform_4(%arg0: i32) -> (i32, i32) {
    %c0_i32 = arith.constant 0 : i32
    %c0_i32_0 = arith.constant 0 : i32
    %c0_i32_1 = arith.constant 0 : i32
    return %c0_i32, %c0_i32_0 : i32, i32
  }
  func.func @transform_5(%arg0: i32) -> (i32, i32) {
    %c0_i32 = arith.constant 0 : i32
    %c0_i32_0 = arith.constant 0 : i32
    %c0_i32_1 = arith.constant 0 : i32
    return %c0_i32, %c0_i32_0 : i32, i32
  }
  func.func @transform_6(%arg0: i32) -> (i32, i32) {
    %c0_i32 = arith.constant 0 : i32
    %c0_i32_0 = arith.constant 0 : i32
    %c0_i32_1 = arith.constant 0 : i32
    return %c0_i32, %c0_i32_0 : i32, i32
  }
  func.func @transform_7(%arg0: i32) -> (i32, i32) {
    %c0_i32 = arith.constant 0 : i32
    %c0_i32_0 = arith.constant 0 : i32
    return %arg0, %c0_i32 : i32, i32
  }
}

</mosaic_0001>

<bundles_post_ra>
// kernel: tensornet_forward.1
= control target key start
LH: loop header
LB: loop body
LE: loop exit
PB: predicated region body
PF: predicated region fallthrough
CT: control target
= control target key end

     0   :  { %12 = vsyncpa [#allocation3], 0  ;;  %s1470_s0 = inlined_call_operand.vmem [shape: f32[64,16], index: 0, kind: input, shape index: {}]   ;;  %s1471_s1 = inlined_call_operand.hbm [shape: f32[16,32], index: 1, kind: input, shape index: {}]   ;;  %s1472_s2 = inlined_call_operand.hbm [shape: f32[1,32], index: 2, kind: input, shape index: {}]   ;;  %s1473_s3 = inlined_call_operand.vmem [shape: f32[32,32], index: 3, kind: input, shape index: {}]   ;;  %s1474_s4 = inlined_call_operand.hbm [shape: f32[1,32], index: 4, kind: input, shape index: {}]   ;;  %s1475_s5 = inlined_call_operand.vmem [shape: f32[32,256], index: 5, kind: input, shape index: {}]   ;;  %s1476_s6 = inlined_call_operand.vmem [shape: f32[1,256], index: 6, kind: input, shape index: {}]   ;;  %s1477_s7 = inlined_call_operand.vmem [shape: f32[64,256], index: 7, kind: output, shape index: {}]  }
   0x1   :  { %13 = vsyncpa [#allocation5], 0  ;;  %s1257_s24 = smov 0  }
   0x2 LB: > { %s1211_s25 = smov [#allocation4]   ;;  %s930_s27 = sadd.s32 4294967295, %s1209_s24   ;;  %s1209_s24 = sphi %s1257_s24, %s19_s24  }
   0x3   : > { %s228_s26 = sshll.u32 %s1211_s25, 4  ;;  %p932_p0 = scmp.ge.s32.totalorder %s1209_s24, 1  ;;  %s229_s26 = int_to_ptr.vmem [resolvable:$true] %s228_s26 }
   0x4   : > { %p202_p1 = scmp.lt.s32.totalorder %s1209_s24, 3  ;;  %p1267_p2 = scmp.eq.s32.totalorder %s930_s27, 0 }
   0x5   : > { %s1212_s30 = smov [#allocation2]   ;;  %s1213_s10 = smov [#allocation6]  }
   0x6   : > { %s1481_s28 = scalar_select %p1267_p2, 1, 0 }
   0x7   : > { %p1271_p3 = pnand %p932_p0, %p202_p1  ;;  %s214_s8 = sshll.u32 %s1212_s30, 4  ;;  %s1283_s8 = int_to_ptr.vmem [resolvable:$true] %s214_s8 }
   0x8   : > { %s242_s11 = sshll.u32 %s1213_s10, 4  ;;  %s1111_s14 = scalar_lea.hbm %s1472_s2, 16  ;;  %s1285_s11 = int_to_ptr.vmem [resolvable:$true] %s242_s11 }
   0x9   : > { %s1482_s29 = scalar_select %p1271_p3, 1, 0 }
   0xa   : > { %p1033_p4 = pneg %p1271_p3  ;;  %p1112_p6 = scmp.ne.s32.totalorder %s1472_s2, %s1111_s14 }
   0xb   : > { %p1118_p10 = scmp.lt.u32.totalorder %s1111_s14, %s1472_s2 }
   0xc   : > { %p1279_p5 = pnand %p1267_p2, %p1033_p4 }
   0xe   : > { %p1295_p7 = pneg %p1279_p5 }
  0x10   : > { %p1114_p8 = pnand %p1295_p7, %p1112_p6 }
  0x12   : > { %p1115_p9 = pneg %p1114_p8 }
  0x14   : > { %p1120_p11 = pnand %p1118_p10, %p1115_p9 }
  0x16   : > { %1123 = shalt.err (!%p1120_p11)
}
  0x17   : > { %s1124_s20 = scalar_lea.vmem %s229_s26, 16  ;;  %s1131_s21 = scalar_lea.vmem %s229_s26, 32 }
  0x18   : > { %p1125_p12 = scmp.ne.s32.totalorder %s229_s26, %s1124_s20  ;;  %p1132_p1 = scmp.lt.s32.totalorder %s229_s26, %s229_s26 }
  0x19   : > { %p1133_p4 = scmp.lt.s32.totalorder %s1131_s21, %s1124_s20 }
  0x1a   : > { %p1127_p13 = pnand %p1125_p12, %p1295_p7 }
  0x1b   : > { %p1134_p2 = por %p1133_p4, %p1132_p1 }
  0x1c   : > { %p1128_p0 = pneg %p1127_p13 }
  0x1e   : > { %p1135_p3 = pnand %p1134_p2, %p1128_p0 }
  0x20   : > { %1138 = shalt.err (!%p1135_p3)
}
  0x21   : > { %1039 = dma.hbm_to_vmem [thread:$0]  (!%p1279_p5), %s1472_s2, 16, %s229_s26, [#allocation5]  }
  0x22   : > { %s1139_s10 = scalar_lea.hbm %s1471_s1, 256 }
  0x23   : > { %p1140_p6 = scmp.ne.s32.totalorder %s1471_s1, %s1139_s10  ;;  %p1146_p2 = scmp.lt.u32.totalorder %s1139_s10, %s1471_s1 }
  0x25   : > { %p1142_p8 = pnand %p1140_p6, %p1295_p7 }
  0x27   : > { %p1143_p9 = pneg %p1142_p8 }
  0x29   : > { %p1148_p3 = pnand %p1146_p2, %p1143_p9 }
  0x2b   : > { %1151 = shalt.err (!%p1148_p3)
}
  0x2c   : > { %s1152_s26 = scalar_lea.vmem %s1283_s8, 256  ;;  %p1160_p13 = scmp.lt.s32.totalorder %s1283_s8, %s1283_s8 }
  0x2d   : > { %p1153_p10 = scmp.ne.s32.totalorder %s1283_s8, %s1152_s26  ;;  %p1161_p0 = scmp.lt.s32.totalorder %s1152_s26, %s1152_s26 }
  0x2f   : > { %p1155_p11 = pnand %p1153_p10, %p1295_p7  ;;  %p1162_p1 = por %p1161_p0, %p1160_p13 }
  0x31   : > { %p1156_p12 = pneg %p1155_p11 }
  0x33   : > { %p1163_p4 = pnand %p1162_p1, %p1156_p12 }
  0x35   : > { %1166 = shalt.err (!%p1163_p4)
}
  0x36   : > { %s1214_s16 = smov 128   ;;  %s1215_s18 = smov 8  }
  0x37   : > { %1036 = dma.hbm_to_vmem [thread:$0]  (!%p1279_p5), %s1471_s1, 256, %s1283_s8, [#allocation3], %s1214_s16, %s1214_s16, %s1215_s18  }
  0x38   : > { %s1167_s23 = scalar_lea.hbm %s1474_s4, 16 }
  0x39   : > { %p1168_p6 = scmp.ne.s32.totalorder %s1474_s4, %s1167_s23  ;;  %p1174_p2 = scmp.lt.u32.totalorder %s1167_s23, %s1474_s4 }
  0x3b   : > { %p1170_p8 = pnand %p1168_p6, %p1295_p7 }
  0x3d   : > { %p1171_p9 = pneg %p1170_p8 }
  0x3f   : > { %p1176_p3 = pnand %p1174_p2, %p1171_p9 }
  0x41   : > { %1179 = shalt.err (!%p1176_p3)
}
  0x42   : > { %s1180_s8 = scalar_lea.vmem %s1285_s11, 16  ;;  %s1187_s13 = scalar_lea.vmem %s1285_s11, 32 }
  0x43   : > { %p1181_p10 = scmp.ne.s32.totalorder %s1285_s11, %s1180_s8  ;;  %p1188_p13 = scmp.lt.s32.totalorder %s1285_s11, %s1285_s11 }
  0x44   : > { %p1189_p0 = scmp.lt.s32.totalorder %s1187_s13, %s1180_s8 }
  0x45   : > { %p1183_p11 = pnand %p1181_p10, %p1295_p7 }
  0x46   : > { %p1190_p1 = por %p1189_p0, %p1188_p13 }
  0x47   : > { %p1184_p12 = pneg %p1183_p11 }
  0x49   : > { %p1191_p4 = pnand %p1190_p1, %p1184_p12 }
  0x4b   : > { %1194 = shalt.err (!%p1191_p4)
}
  0x4c   : > { %1042 = dma.hbm_to_vmem [thread:$0]  (!%p1279_p5), %s1474_s4, 16, %s1285_s11, [#allocation5]  }
  0x4d   : > { %p1485_p6 = scmp.ne.s32.totalorder %s1482_s29, 0 }
  0x4e   : > { %p1486_p7 = scmp.ne.s32.totalorder (!%p1485_p6), %s1481_s28, 0 }
  0x4f   : > { %270 = sbr.rel (%p1485_p6) target bundleno = 852 (0x354), region = 48 }
  0x56   : > { %1200 = dma.done.wait (%p1486_p7), [#allocation3], 256  }
  0x57   : > { %1202 = vsyncadd (%p1486_p7), [#allocation3], 4294967040 }
  0x58   : > { %1204 = dma.done.wait (%p1486_p7), [#allocation5], 32  }
  0x59   : > { %1206 = vsyncadd (%p1486_p7), [#allocation5], 4294967264  ;;  %s941_s9 = sshll.u32 %s930_s27, 2  ;;  %vm337_vm0 = vcmask 130048   ;;  %v328_v0 = vld [vmem:[#allocation2] sm:$0xff]  ;;  %v329_v1 = vld [vmem:[#allocation2 + $0x8] sm:$0xff] }
  0x5a   : > { %p312_p8 = scmp.lt.s32.totalorder %s941_s9, 7  ;;  %v1001_v3 = vpack.c.bf16 %v329_v1, %v328_v0  ;;  %v491_v7 = vld [vmem:[%s1473_s3] sm:$0xff]  ;;  %v492_v8 = vld [vmem:[%s1473_s3 + $0x8] sm:$0xff]  ;;  %v493_v10 = vld [vmem:[%s1473_s3 + $0x10] sm:$0xff]  ;;  %vm502_vm3 = vcmask 261120  }
  0x5b   : > { %v1005_v9 = vpack.c.bf16 %v492_v8, %v491_v7  ;;  %v494_v11 = vld [vmem:[%s1473_s3 + $0x18] sm:$0xff]  ;;  %v946_v13 = vld [vmem:[#allocation4] ss:$0 sm:$0xff]  ;;  %v713_v7 = vld [vmem:[%s1475_s5 + $0x8] sm:$0xff] }
  0x5c   : > { %s1490_s9 = smov (!%p312_p8, %s941_s9), 7  ;;  %1002 = vmatprep.subr.bf16.mxu1 %v1001_v3  ;;  %v1009_v12 = vpack.c.bf16 %v494_v11, %v493_v10  ;;  %v715_v8 = vld [vmem:[%s1475_s5 + $0x18] sm:$0xff]  ;;  %v714_v11 = vld [vmem:[%s1475_s5 + $0x10] sm:$0xff] }
  0x5d   : > { %s942_s29 = sshll.u32 %s1490_s9, 3  ;;  %1004 = vmatpush3.bf16.msra.mxu1 %v1001_v3  ;;  %v1013_v10 = vpack.c.bf16 %v715_v8, %v713_v7  ;;  %s962_s20 = sshll.u32 %s1490_s9, 4 }
  0x5e   : > { %s315_s26 = scalar_lea.vmem %s1470_s0, %s942_s29  ;;  %1006 = vmatprep.subr.bf16.mxu1 %v1005_v9  ;;  %s322_s23 = scalar_lea.vmem %s1477_s7, %s962_s20 }
  0x5f   : > { %v324_v2 = vld [vmem:[%s315_s26] sm:$0xff]  ;;  %v325_v4 = vld [vmem:[%s315_s26 + $0x8] sm:$0xff]  ;;  %v326_v5 = vld [vmem:[%s315_s26 + $0x10] sm:$0xff]  ;;  %1014 = vmatprep.subr.bf16.mxu0 %v1013_v10 }
  0x60   : > { %981 = vmatprep.mubr.msk.f32.mxu1 %vm337_vm0, %v324_v2  ;;  %v327_v6 = vld [vmem:[%s315_s26 + $0x18] sm:$0xff] }
  0x61   : > { %982 = vmatmul.mubr.msk.f32.vlgmr.msra.gmra.mrb[0].mxu1 %vm337_vm0, %v325_v4 }
  0x62   : > { %984 = vmatprep.mubr.msk.f32.mxu1 %vm337_vm0, %v326_v5  ;;  %1008 = vmatpush3.bf16.msra.mxu1 %v1005_v9  ;;  %v712_v9 = vld [vmem:[%s1475_s5] sm:$0xff] }
  0x63   : > { %1010 = vmatprep.subr.bf16.mxu1 %v1009_v12 }
  0x65   : > { %985 = vmatmul.mubr.msk.f32.gmra.mrb[2].mxu1 %vm337_vm0, %v327_v6 }
  0x66   : > { %1012 = vmatpush3.bf16.msra.mxu1 %v1009_v12  ;;  %v717_v12 = vld [vmem:[%s1475_s5 + $0x28] sm:$0xff] }
 0x134   : > { %v983_v14 = vpop.f32.mrb[0].mxu1 }
 0x135   : > { %v422_v15 = vadd.f32 %v983_v14, %v946_v13  ;;  %v416_v16 = vpop.f32.mrb[1].mxu1  ;;  %v1216_v14 = vmov 0.0  }
 0x136   : > { %v417_v17 = vadd.f32 %v946_v13, %v416_v16  ;;  %808 = vmatprep.mubr.f32.mxu0 %v1216_v14 }
 0x137   : > { %v436_v18 = vmin.f32 %v422_v15, 20.0  ;;  %vm448_vm5 = vcmp.gt.f32.partialorder %v422_v15, 20.0 }
 0x138   : > { %v435_v19 = vmin.f32 %v417_v17, 20.0  ;;  %v986_v20 = vpop.f32.mrb[2].mxu1  ;;  %vm447_vm4 = vcmp.gt.f32.partialorder %v417_v17, 20.0 }
 0x139   : > { %v441_v21 = vmul.f32 1.442695, %v436_v18  ;;  %v1388_v22 = vadd.f32 %v986_v20, %v946_v13  ;;  %v426_v23 = vpop.f32.mrb[3].mxu1  ;;  %v718_v18 = vld [vmem:[%s1475_s5 + $0x30] sm:$0xff] }
 0x13a   : > { %v439_v24 = vmul.f32 1.442695, %v435_v19  ;;  %v1390_v25 = vadd.f32 %v946_v13, %v426_v23  ;;  %v719_v13 = vld [vmem:[%s1475_s5 + $0x38] sm:$0xff]  ;;  %v951_v20 = vld [vmem:[#allocation6] ss:$0 sm:$0xff] }
 0x13b   : > { %1063 = vpow2.f32 %v441_v21  ;;  %v438_v26 = vmin.f32 %v1388_v22, 20.0  ;;  %vm450_vm9 = vcmp.gt.f32.partialorder %v1388_v22, 20.0  ;;  %v1017_v16 = vpack.c.bf16 %v719_v13, %v717_v12 }
 0x13c   : > { %1065 = vpow2.f32 %v439_v24  ;;  %v437_v27 = vmin.f32 %v1390_v25, 20.0  ;;  %vm449_vm8 = vcmp.gt.f32.partialorder %v1390_v25, 20.0 }
 0x13d   : > { %v445_v28 = vmul.f32 1.442695, %v438_v26 }
 0x13e   : > { %v443_v29 = vmul.f32 1.442695, %v437_v27 }
 0x13f   : > { %1067 = vpow2.f32 %v445_v28 }
 0x140   : > { %1069 = vpow2.f32 %v443_v29 }
 0x145   : > { %v1064_v30 = vpop.eup %1063 }
 0x146   : > { %v1066_v31 = vpop.eup %1065  ;;  %v460_v32 = vadd.f32 1.0, %v1064_v30  ;;  %v463_v37 = vmul.f32 -0.5, %v1064_v30  ;;  %v466_v41 = vand.u32 2147483647, %v1064_v30 }
 0x147   : > { %v451_v33 = vadd.f32 1.0, %v1066_v31  ;;  %v454_v39 = vmul.f32 -0.5, %v1066_v31  ;;  %v457_v45 = vand.u32 2147483647, %v1066_v31 }
 0x148   : > { %1071 = vlog2.f32 %v460_v32  ;;  %v464_v40 = vadd.f32 1.0, %v463_v37  ;;  %vm1394_vm1 = vcmp.lt.f32.partialorder %v466_v41, 0.0004427343 }
 0x149   : > { %v1068_v34 = vpop.eup %1067  ;;  %1073 = vlog2.f32 %v451_v33  ;;  %v455_v43 = vadd.f32 1.0, %v454_v39  ;;  %vm458_vm2 = vcmp.lt.f32.partialorder %v457_v45, 0.0004427343 }
 0x14a   : > { %v1070_v35 = vpop.eup %1069  ;;  %v478_v36 = vadd.f32 1.0, %v1068_v34  ;;  %v481_v42 = vmul.f32 -0.5, %v1068_v34  ;;  %v465_v49 = vmul.f32 %v1064_v30, %v464_v40  ;;  %v484_v55 = vand.u32 2147483647, %v1068_v34 }
 0x14b   : > { %v469_v38 = vadd.f32 1.0, %v1070_v35  ;;  %v472_v44 = vmul.f32 -0.5, %v1070_v35  ;;  %v456_v53 = vmul.f32 %v1066_v31, %v455_v43  ;;  %v475_v57 = vand.u32 2147483647, %v1070_v35 }
 0x14c   : > { %1075 = vlog2.f32 %v478_v36  ;;  %v482_v51 = vadd.f32 1.0, %v481_v42  ;;  %vm485_vm6 = vcmp.lt.f32.partialorder %v484_v55, 0.0004427343 }
 0x14d   : > { %1077 = vlog2.f32 %v469_v38  ;;  %v473_v54 = vadd.f32 1.0, %v472_v44  ;;  %vm476_vm7 = vcmp.lt.f32.partialorder %v475_v57, 0.0004427343 }
 0x14e   : > { %v483_v63 = vmul.f32 %v1068_v34, %v482_v51 }
 0x14f   : > { %v474_v2 = vmul.f32 %v1070_v35, %v473_v54 }
 0x152   : > { %v1072_v46 = vpop.eup %1071 }
 0x153   : > { %v1074_v47 = vpop.eup %1073  ;;  %v462_v48 = vmul.f32 0.6931472, %v1072_v46 }
 0x154   : > { %v453_v52 = vmul.f32 0.6931472, %v1074_v47 }
 0x155   : > { %v468_v56 = vsel %vm1394_vm1, %v465_v49, %v462_v48 }
 0x156   : > { %v1076_v58 = vpop.eup %1075  ;;  %v459_v59 = vsel %vm458_vm2, %v456_v53, %v453_v52  ;;  %v488_v0 = vsel %vm448_vm5, %v422_v15, %v468_v56  ;;  %v1015_v15 = vpack.c.bf16 %v714_v11, %v712_v9 }
 0x157   : > { %v1078_v60 = vpop.eup %1077  ;;  %v487_v61 = vsel %vm447_vm4, %v417_v17, %v459_v59  ;;  %v480_v62 = vmul.f32 0.6931472, %v1076_v58  ;;  %v716_v17 = vld [vmem:[%s1475_s5 + $0x20] sm:$0xff] }
 0x158   : > { %995 = vmatprep.mubr.msk.f32.mxu1 %vm502_vm3, %v487_v61  ;;  %v471_v1 = vmul.f32 0.6931472, %v1078_v60  ;;  %1016 = vmatpush1.bf16.msra.mxu0 %v1015_v15  ;;  %v1019_v19 = vpack.c.bf16 %v718_v18, %v716_v17 }
 0x159   : > { %996 = vmatmul.mubr.msk.f32.vlgmr.msra.gmra.mrb[4].mxu1 %vm502_vm3, %v488_v0  ;;  %v486_v3 = vsel %vm485_vm6, %v483_v63, %v480_v62  ;;  %1018 = vmatprep.subr.bf16.mxu0 %v1017_v16 }
 0x15a   : > { %v477_v4 = vsel %vm476_vm7, %v474_v2, %v471_v1  ;;  %v490_v6 = vsel %vm450_vm9, %v1388_v22, %v486_v3 }
 0x15b   : > { %v489_v5 = vsel %vm449_vm8, %v1390_v25, %v477_v4 }
 0x15c   : > { %998 = vmatprep.mubr.msk.f32.mxu1 %vm502_vm3, %v489_v5  ;;  %1020 = vmatpush1.bf16.msra.mxu0 %v1019_v19 }
 0x15d   : > { %999 = vmatmul.mubr.msk.f32.gmra.mrb[6].mxu1 %vm502_vm3, %v490_v6 }
 0x22c   : > { %v997_v21 = vpop.f32.mrb[4].mxu1 }
 0x22d   : > { %v587_v22 = vadd.f32 %v997_v21, %v951_v20  ;;  %v581_v23 = vpop.f32.mrb[5].mxu1 }
 0x22e   : > { %v582_v24 = vadd.f32 %v951_v20, %v581_v23 }
 0x22f   : > { %v601_v25 = vmin.f32 %v587_v22, 20.0  ;;  %vm613_vm11 = vcmp.gt.f32.partialorder %v587_v22, 20.0 }
 0x230   : > { %v600_v26 = vmin.f32 %v582_v24, 20.0  ;;  %v1000_v27 = vpop.f32.mrb[6].mxu1  ;;  %vm612_vm13 = vcmp.gt.f32.partialorder %v582_v24, 20.0 }
 0x231   : > { %v606_v28 = vmul.f32 1.442695, %v601_v25  ;;  %v1433_v29 = vadd.f32 %v1000_v27, %v951_v20  ;;  %v591_v30 = vpop.f32.mrb[7].mxu1 }
 0x232   : > { %v604_v31 = vmul.f32 1.442695, %v600_v26  ;;  %v1435_v32 = vadd.f32 %v951_v20, %v591_v30 }
 0x233   : > { %1079 = vpow2.f32 %v606_v28  ;;  %v603_v33 = vmin.f32 %v1433_v29, 20.0  ;;  %vm615_vm15 = vcmp.gt.f32.partialorder %v1433_v29, 20.0 }
 0x234   : > { %1081 = vpow2.f32 %v604_v31  ;;  %v602_v34 = vmin.f32 %v1435_v32, 20.0  ;;  %vm614_vm1 = vcmp.gt.f32.partialorder %v1435_v32, 20.0 }
 0x235   : > { %v610_v35 = vmul.f32 1.442695, %v603_v33 }
 0x236   : > { %v608_v36 = vmul.f32 1.442695, %v602_v34 }
 0x237   : > { %1083 = vpow2.f32 %v610_v35 }
 0x238   : > { %1085 = vpow2.f32 %v608_v36 }
 0x23d   : > { %v1080_v37 = vpop.eup %1079 }
 0x23e   : > { %v1082_v38 = vpop.eup %1081  ;;  %v625_v39 = vadd.f32 1.0, %v1080_v37  ;;  %v628_v44 = vmul.f32 -0.5, %v1080_v37  ;;  %v631_v48 = vand.u32 2147483647, %v1080_v37 }
 0x23f   : > { %v616_v40 = vadd.f32 1.0, %v1082_v38  ;;  %v619_v46 = vmul.f32 -0.5, %v1082_v38  ;;  %v622_v52 = vand.u32 2147483647, %v1082_v38 }
 0x240   : > { %1087 = vlog2.f32 %v625_v39  ;;  %v629_v47 = vadd.f32 1.0, %v628_v44  ;;  %vm632_vm10 = vcmp.lt.f32.partialorder %v631_v48, 0.0004427343 }
 0x241   : > { %v1084_v41 = vpop.eup %1083  ;;  %1089 = vlog2.f32 %v616_v40  ;;  %v620_v50 = vadd.f32 1.0, %v619_v46  ;;  %vm623_vm12 = vcmp.lt.f32.partialorder %v622_v52, 0.0004427343 }
 0x242   : > { %v1086_v42 = vpop.eup %1085  ;;  %v643_v43 = vadd.f32 1.0, %v1084_v41  ;;  %v646_v49 = vmul.f32 -0.5, %v1084_v41  ;;  %v630_v56 = vmul.f32 %v1080_v37, %v629_v47  ;;  %v649_v60 = vand.u32 2147483647, %v1084_v41 }
 0x243   : > { %v634_v45 = vadd.f32 1.0, %v1086_v42  ;;  %v637_v51 = vmul.f32 -0.5, %v1086_v42  ;;  %v621_v59 = vmul.f32 %v1082_v38, %v620_v50  ;;  %v640_v63 = vand.u32 2147483647, %v1086_v42 }
 0x244   : > { %1091 = vlog2.f32 %v643_v43  ;;  %v647_v57 = vadd.f32 1.0, %v646_v49  ;;  %vm650_vm14 = vcmp.lt.f32.partialorder %v649_v60, 0.0004427343 }
 0x245   : > { %1093 = vlog2.f32 %v634_v45  ;;  %v638_v61 = vadd.f32 1.0, %v637_v51  ;;  %vm641_vm0 = vcmp.lt.f32.partialorder %v640_v63, 0.0004427343 }
 0x246   : > { %v648_v7 = vmul.f32 %v1084_v41, %v647_v57 }
 0x247   : > { %v639_v10 = vmul.f32 %v1086_v42, %v638_v61 }
 0x24a   : > { %v1088_v53 = vpop.eup %1087 }
 0x24b   : > { %v1090_v54 = vpop.eup %1089  ;;  %v627_v55 = vmul.f32 0.6931472, %v1088_v53 }
 0x24c   : > { %v618_v58 = vmul.f32 0.6931472, %v1090_v54 }
 0x24d   : > { %v633_v62 = vsel %vm632_vm10, %v630_v56, %v627_v55 }
 0x24e   : > { %v1092_v0 = vpop.eup %1091  ;;  %v1439_v1 = vsel %vm613_vm11, %v587_v22, %v633_v62  ;;  %v624_v2 = vsel %vm623_vm12, %v621_v59, %v618_v58  ;;  %v722_v62 = vlaneseq }
 0x24f   : > { %v1094_v3 = vpop.eup %1093  ;;  %v657_v4 = vmin.f32 %v1439_v1, 20.0  ;;  %v652_v5 = vsel %vm612_vm13, %v582_v24, %v624_v2  ;;  %v645_v6 = vmul.f32 0.6931472, %v1092_v0  ;;  %vm669_vm6 = vcmp.gt.f32.partialorder %v1439_v1, 20.0 }
 0x250   : > { %v656_v8 = vmin.f32 %v652_v5, 20.0  ;;  %v636_v9 = vmul.f32 0.6931472, %v1094_v3  ;;  %vm668_vm2 = vcmp.gt.f32.partialorder %v652_v5, 20.0  ;;  %v723_v63 = vshrl.u32 %v722_v62, 7 }
 0x251   : > { %v662_v11 = vmul.f32 1.442695, %v657_v4  ;;  %v651_v12 = vsel %vm650_vm14, %v648_v7, %v645_v6 }
 0x252   : > { %v660_v13 = vmul.f32 1.442695, %v656_v8  ;;  %v1444_v15 = vsel %vm615_vm15, %v1433_v29, %v651_v12  ;;  %v642_v16 = vsel %vm641_vm0, %v639_v10, %v636_v9  ;;  %v724_v0 = vsub.s32 0, %v723_v63 }
 0x253   : > { %1095 = vpow2.f32 %v662_v11  ;;  %v659_v17 = vmin.f32 %v1444_v15, 20.0  ;;  %v654_v18 = vsel %vm614_vm1, %v1435_v32, %v642_v16  ;;  %vm671_vm10 = vcmp.gt.f32.partialorder %v1444_v15, 20.0 }
 0x254   : > { %1097 = vpow2.f32 %v660_v13  ;;  %v658_v19 = vmin.f32 %v654_v18, 20.0  ;;  %vm670_vm8 = vcmp.gt.f32.partialorder %v654_v18, 20.0  ;;  %v728_v2 = vsub.s32 1, %v723_v63 }
 0x255   : > { %v666_v20 = vmul.f32 1.442695, %v659_v17 }
 0x256   : > { %v664_v21 = vmul.f32 1.442695, %v658_v19 }
 0x257   : > { %1099 = vpow2.f32 %v666_v20 }
 0x258   : > { %1101 = vpow2.f32 %v664_v21 }
 0x25d   : > { %v1096_v22 = vpop.eup %1095 }
 0x25e   : > { %v1098_v23 = vpop.eup %1097  ;;  %v681_v24 = vadd.f32 1.0, %v1096_v22  ;;  %v684_v31 = vmul.f32 -0.5, %v1096_v22  ;;  %v687_v38 = vand.u32 2147483647, %v1096_v22 }
 0x25f   : > { %v672_v25 = vadd.f32 1.0, %v1098_v23  ;;  %v675_v30 = vmul.f32 -0.5, %v1098_v23  ;;  %v678_v33 = vand.u32 2147483647, %v1098_v23 }
 0x260   : > { %1103 = vlog2.f32 %v681_v24  ;;  %v685_v35 = vadd.f32 1.0, %v684_v31  ;;  %vm688_vm5 = vcmp.lt.f32.partialorder %v687_v38, 0.0004427343 }
 0x261   : > { %v1100_v26 = vpop.eup %1099  ;;  %1105 = vlog2.f32 %v672_v25  ;;  %v676_v32 = vadd.f32 1.0, %v675_v30  ;;  %vm679_vm4 = vcmp.lt.f32.partialorder %v678_v33, 0.0004427343 }
 0x262   : > { %v1102_v27 = vpop.eup %1101  ;;  %v699_v29 = vadd.f32 1.0, %v1100_v26  ;;  %v686_v43 = vmul.f32 %v1096_v22, %v685_v35  ;;  %v702_v45 = vmul.f32 -0.5, %v1100_v26  ;;  %v705_v55 = vand.u32 2147483647, %v1100_v26 }
 0x263   : > { %v690_v28 = vadd.f32 1.0, %v1102_v27  ;;  %v693_v36 = vmul.f32 -0.5, %v1102_v27  ;;  %v677_v40 = vmul.f32 %v1098_v23, %v676_v32  ;;  %v696_v48 = vand.u32 2147483647, %v1102_v27 }
 0x264   : > { %v703_v53 = vadd.f32 1.0, %v702_v45  ;;  %vm706_vm9 = vcmp.lt.f32.partialorder %v705_v55, 0.0004427343 }
 0x265   : > { %1107 = vlog2.f32 %v690_v28  ;;  %v694_v44 = vadd.f32 1.0, %v693_v36  ;;  %vm697_vm7 = vcmp.lt.f32.partialorder %v696_v48, 0.0004427343 }
 0x266   : > { %1109 = vlog2.f32 %v699_v29  ;;  %v704_v58 = vmul.f32 %v1100_v26, %v703_v53 }
 0x267   : > { %v695_v52 = vmul.f32 %v1102_v27, %v694_v44 }
 0x26a   : > { %v1104_v34 = vpop.eup %1103 }
 0x26b   : > { %v1106_v37 = vpop.eup %1105  ;;  %v683_v41 = vmul.f32 0.6931472, %v1104_v34 }
 0x26c   : > { %v674_v39 = vmul.f32 0.6931472, %v1106_v37 }
 0x26d   : > { %v689_v49 = vsel %vm688_vm5, %v686_v43, %v683_v41 }
 0x26e   : > { %v680_v42 = vsel %vm679_vm4, %v677_v40, %v674_v39  ;;  %v709_v54 = vsel %vm669_vm6, %v1439_v1, %v689_v49  ;;  %v720_v1 = vld [vmem:[%s1476_s6] sm:$0x3] }
 0x26f   : > { %v1108_v46 = vpop.eup %1107  ;;  %v708_v47 = vsel %vm668_vm2, %v652_v5, %v680_v42  ;;  %v725_v3 = vrot.slane %v720_v1, %v724_v0  ;;  %v729_v4 = vrot.slane %v720_v1, %v728_v2 }
 0x270   : > { %956 = vmatmul.mubr.msk.f32.vlgmr.msra.gmra.mrb[0].mxu0 %vm502_vm3, %v708_v47  ;;  %v692_v50 = vmul.f32 0.6931472, %v1108_v46  ;;  %v1110_v51 = vpop.eup %1109 }
 0x271   : > { %814 = vmatprep.mubr.f32.mxu0 %v1216_v14  ;;  %v701_v57 = vmul.f32 0.6931472, %v1110_v51 }
 0x272   : > { %v698_v56 = vsel %vm697_vm7, %v695_v52, %v692_v50 }
 0x273   : > { %v710_v59 = vsel %vm670_vm8, %v654_v18, %v698_v56  ;;  %v707_v60 = vsel %vm706_vm9, %v704_v58, %v701_v57 }
 0x274   : > { %957 = vmatmul.mubr.msk.f32.gmra.mrb[2].mxu0 %vm502_vm3, %v709_v54  ;;  %v711_v61 = vsel %vm671_vm10, %v1444_v15, %v707_v60 }
 0x275   : > { %820 = vmatprep.mubr.f32.mxu0 %v1216_v14 }
 0x278   : > { %958 = vmatmul.mubr.msk.f32.gmra.mrb[4].mxu0 %vm502_vm3, %v710_v59 }
 0x279   : > { %826 = vmatprep.mubr.f32.mxu0 %v1216_v14 }
 0x27c   : > { %959 = vmatmul.mubr.msk.f32.gmra.mrb[6].mxu0 %vm502_vm3, %v711_v61 }
 0x343   : > { %v810_v14 = vpop.f32.mrb[0].mxu0 }
 0x344   : > { %v811_v5 = vadd.f32 %v810_v14, %v725_v3  ;;  %v812_v6 = vpop.f32.mrb[1].mxu0 }
 0x345   : > { %v813_v7 = vadd.f32 %v812_v6, %v729_v4 }
 0x346   : > { %833 = vst [vmem:[%s322_s23] sm:$0xff] %v811_v5 }
 0x347   : > { %834 = vst [vmem:[%s322_s23 + $0x8] sm:$0xff] %v813_v7  ;;  %v816_v8 = vpop.f32.mrb[2].mxu0 }
 0x348   : > { %v817_v9 = vadd.f32 %v816_v8, %v725_v3  ;;  %v818_v10 = vpop.f32.mrb[3].mxu0 }
 0x349   : > { %v819_v11 = vadd.f32 %v818_v10, %v729_v4 }
 0x34a   : > { %835 = vst [vmem:[%s322_s23 + $0x10] sm:$0xff] %v817_v9 }
 0x34b   : > { %836 = vst [vmem:[%s322_s23 + $0x18] sm:$0xff] %v819_v11  ;;  %v822_v12 = vpop.f32.mrb[4].mxu0 }
 0x34c   : > { %v823_v13 = vadd.f32 %v822_v12, %v725_v3  ;;  %v824_v15 = vpop.f32.mrb[5].mxu0 }
 0x34d   : > { %v825_v16 = vadd.f32 %v824_v15, %v729_v4 }
 0x34e   : > { %837 = vst [vmem:[%s322_s23 + $0x20] sm:$0xff] %v823_v13 }
 0x34f   : > { %838 = vst [vmem:[%s322_s23 + $0x28] sm:$0xff] %v825_v16  ;;  %v828_v17 = vpop.f32.mrb[6].mxu0 }
 0x350   : > { %v829_v18 = vadd.f32 %v828_v17, %v725_v3  ;;  %v830_v19 = vpop.f32.mrb[7].mxu0 }
 0x351   : > { %v831_v20 = vadd.f32 %v830_v19, %v729_v4 }
 0x352   : > { %839 = vst [vmem:[%s322_s23 + $0x30] sm:$0xff] %v829_v18 }
 0x353   : > { %840 = vst [vmem:[%s322_s23 + $0x38] sm:$0xff] %v831_v20 }
 0x354 PF: > { %s19_s24 = sadd.s32 1, %s1209_s24  }
 0x355   : > { %p16_p5 = scmp.ge.s32.totalorder %s19_s24, 4  }
 0x357   :  { %18 = sbr.rel (!%p16_p5) target bundleno = 2 (0x2), region = 91 }
 0x35e   :  { %865 = vsyncpa [#allocation3], 1 }
 0x35f   :  { %867 = vsyncpa [#allocation3 + $0x1], 1 }
 0x360   :  { %868 = vsyncpa [#allocation5], 1 }

</bundles_post_ra>
